<compile_context>
chip_gen: v7x
topology: tpu7x:2x2x1
jax: 0.10.0
libtpu: 0.0.40
codegen_flags: <defaults>
</compile_context>

<pallas_src>
import functools

import numpy as np
import jax
import jax.numpy as jnp
from jax.experimental import pallas as pl
from jax.experimental.pallas import tpu as pltpu

try:
    from scipy.optimize import linear_sum_assignment as _scipy_lsa
except Exception:  # pragma: no cover
    _scipy_lsa = None

# Kept for documentation; the kp3d matching cost built from these is dead code in the
# reference (the Hungarian matcher consumes only cost_giou), so it is not computed here.
H36M_TO_J17 = [6, 5, 4, 1, 2, 3, 16, 15, 14, 11, 12, 13, 8, 10, 0, 7, 9]
H36M_TO_J14 = H36M_TO_J17[:14]


# ------------------------------------------------------------------
# Fused Pallas kernel
# ------------------------------------------------------------------

def _precise_recip(x):
    """EUP approximate reciprocal + one Newton step (near-exact f32)."""
    r = pl.reciprocal(x, approx=True)
    return r * (2.0 - x * r)


def _sigmoid(x):
    return _precise_recip(1.0 + jnp.exp(-x))


def _postprocess_fused_kernel(
        logit_ref, box_ref, bscale_ref, kpt_ref, kscale_ref, gbox_ref,
        score_ref, boxo_ref, kpto_ref, cgiou_ref,
        *, to_xyxy, test):
    """All refs carry a leading block dim Bb (1 per grid step, or the full batch).

    logit_ref : (Bb, 1, Np)        raw top-k logits
    box_ref   : (Bb, 4, Np)        gathered boxes, cxcywh (normalized), coord rows x box lanes
    bscale_ref: (Bb, 4, 1)         [W, H, W, H]
    kpt_ref   : (Bb, Dk_pad, Np)   gathered keypoints [x0,y0,...,v0,...], kp-dim rows x box lanes
    kscale_ref: (Bb, Dk_pad, 1)    [W,H]*nbp ++ [1]*nbp (zero padded rows)
    gbox_ref  : (Bb, Gm_pad, 4)    gt boxes, xyxy (pixels), zero-padded rows
    """
    bb, gm, npad = cgiou_ref.shape

    # scores: sigmoid of the already-selected logits (== values of topk(sigmoid(x))).
    score_ref[...] = _sigmoid(logit_ref[...])

    # keypoints: scale x/y rows by (W, H); visibility rows pass through (scale == 1).
    kpto_ref[...] = kpt_ref[...] * kscale_ref[...]

    # boxes: scale to pixels, then cxcywh -> xyxy; all rows are lane-dense (1, Np).
    b = box_ref[...] * bscale_ref[...]                    # (Bb, 4, Np)
    if to_xyxy:
        cx, cy = b[:, 0:1, :], b[:, 1:2, :]
        hw, hh = 0.5 * b[:, 2:3, :], 0.5 * b[:, 3:4, :]
        px1, py1, px2, py2 = cx - hw, cy - hh, cx + hw, cy + hh
    else:
        px1, py1 = b[:, 0:1, :], b[:, 1:2, :]
        px2, py2 = b[:, 2:3, :], b[:, 3:4, :]
    if test:
        # NOTE: this intentionally mirrors the reference, which mutates `boxes`
        # in place (xyxy -> x1,y1,w,h) BEFORE the gather/scale AND before the
        # GIoU matching cost — so both the returned boxes and the matching cost
        # use the mutated form in test mode.
        px2 = px2 - px1
        py2 = py2 - py1
    # single unmasked (Bb, 4, Np) store instead of 4 masked row stores
    boxo_ref[...] = jnp.concatenate([px1, py1, px2, py2], axis=1)

    # pairwise cost_giou = -GIoU(pred, gt), vectorized across the gt (sublane) dim.
    gbx = gbox_ref[...]                                   # (Bb, Gm_pad, 4)
    full = (bb, gm, npad)
    PX1 = jnp.broadcast_to(px1, full)
    PY1 = jnp.broadcast_to(py1, full)
    PX2 = jnp.broadcast_to(px2, full)
    PY2 = jnp.broadcast_to(py2, full)
    GX1 = jnp.broadcast_to(gbx[:, :, 0:1], full)
    GY1 = jnp.broadcast_to(gbx[:, :, 1:2], full)
    GX2 = jnp.broadcast_to(gbx[:, :, 2:3], full)
    GY2 = jnp.broadcast_to(gbx[:, :, 3:4], full)

    eps = 1e-7
    area_p = (PX2 - PX1) * (PY2 - PY1)
    area_g = (GX2 - GX1) * (GY2 - GY1)
    iw = jnp.maximum(jnp.minimum(PX2, GX2) - jnp.maximum(PX1, GX1), 0.0)
    ih = jnp.maximum(jnp.minimum(PY2, GY2) - jnp.maximum(PY1, GY1), 0.0)
    inter = iw * ih
    union = area_p + area_g - inter
    iou = inter * _precise_recip(union + eps)
    cw = jnp.maximum(PX2, GX2) - jnp.minimum(PX1, GX1)
    ch = jnp.maximum(PY2, GY2) - jnp.minimum(PY1, GY1)
    area_c = cw * ch
    giou = iou - (area_c - union) * _precise_recip(area_c + eps)
    cgiou_ref[...] = -giou                                # one (Bb, Gm_pad, Np) store


def _default_collapse_batch(B):
    """Fold the batch into one grid step on single-TensorCore chips (v5e/v6e)."""
    if B <= 1:
        return True
    try:
        kind = jax.devices()[0].device_kind.lower()
    except Exception:
        kind = ""
    multi_tc = ("v7" in kind) or ("v4" in kind) or ("v5p" in kind)
    if multi_tc:
        return False          # keep grid=(B,) + "parallel" so both TCs get work
    return B <= 8             # single TC: grid is a pure loop; drop per-step overhead


def fused_postprocess_pallas(logits, boxes_t, bscale, kpts, kscale, gbox,
                             *, to_xyxy=True, test=False, collapse_batch=None):
    """One fused pallas_call: sigmoid + box convert/scale + kpt scale + pairwise -GIoU."""
    B, _, Np = logits.shape
    Dk = kpts.shape[1]
    Gm = gbox.shape[1]
    if collapse_batch is None:
        collapse_batch = _default_collapse_batch(B)
    blk_b = B if collapse_batch else 1
    nblk = B // blk_b

    kern = functools.partial(_postprocess_fused_kernel, to_xyxy=to_xyxy, test=test)

    out_shape = (
        jax.ShapeDtypeStruct((B, 1, Np), jnp.float32),    # scores
        jax.ShapeDtypeStruct((B, 4, Np), jnp.float32),    # boxes (scaled, coord-major)
        jax.ShapeDtypeStruct((B, Dk, Np), jnp.float32),   # scaled keypoints
        jax.ShapeDtypeStruct((B, Gm, Np), jnp.float32),   # cost_giou (= -GIoU)
    )

    def im(b):
        return (b, 0, 0)

    in_specs = [
        pl.BlockSpec((blk_b, 1, Np), im),
        pl.BlockSpec((blk_b, 4, Np), im),
        pl.BlockSpec((blk_b, 4, 1), im),
        pl.BlockSpec((blk_b, Dk, Np), im),
        pl.BlockSpec((blk_b, Dk, 1), im),
        pl.BlockSpec((blk_b, Gm, 4), im),
    ]
    out_specs = (
        pl.BlockSpec((blk_b, 1, Np), im),
        pl.BlockSpec((blk_b, 4, Np), im),
        pl.BlockSpec((blk_b, Dk, Np), im),
        pl.BlockSpec((blk_b, Gm, Np), im),
    )

    in_elems = B * (Np + 4 * Np + 4 + Dk * Np + Dk + Gm * 4)
    out_elems = B * (Np + 4 * Np + Dk * Np + Gm * Np)
    cost = pl.CostEstimate(
        flops=int(B * Np * (Dk + 14 + 32 * Gm)),
        transcendentals=int(B * Np * (2 + 2 * Gm)),
        bytes_accessed=int(4 * (in_elems + out_elems)),
    )

    return pl.pallas_call(
        kern,
        grid=(nblk,),
        in_specs=in_specs,
        out_specs=out_specs,
        out_shape=out_shape,
        compiler_params=pltpu.CompilerParams(
            dimension_semantics=("parallel",)),   # shards across TCs on v7x; no-op on v5e/v6e
        cost_estimate=cost,
    )(logits, boxes_t, bscale, kpts, kscale, gbox)


# ------------------------------------------------------------------
# Numpy reference of the fused kernel (used for in-script validation)
# ------------------------------------------------------------------

def _fused_reference(logits, boxes_t, bscale, kpts, kscale, gbox,
                     *, to_xyxy=True, test=False):
    logits, boxes_t, bscale, kpts, kscale, gbox = [
        np.asarray(a, np.float64) for a in (logits, boxes_t, bscale, kpts, kscale, gbox)]
    scores = 1.0 / (1.0 + np.exp(-logits))
    b = boxes_t * bscale
    if to_xyxy:
        cx, cy, w, h = b[:, 0], b[:, 1], b[:, 2], b[:, 3]
        x1, y1, x2, y2 = cx - 0.5 * w, cy - 0.5 * h, cx + 0.5 * w, cy + 0.5 * h
    else:
        x1, y1, x2, y2 = b[:, 0], b[:, 1], b[:, 2], b[:, 3]
    if test:
        x2 = x2 - x1
        y2 = y2 - y1
    boxes = np.stack([x1, y1, x2, y2], axis=1)
    kpt_out = kpts * kscale
    px1, py1, px2, py2 = (x1[:, None, :], y1[:, None, :], x2[:, None, :], y2[:, None, :])
    gx1, gy1 = gbox[:, :, 0][:, :, None], gbox[:, :, 1][:, :, None]
    gx2, gy2 = gbox[:, :, 2][:, :, None], gbox[:, :, 3][:, :, None]
    area_p = (px2 - px1) * (py2 - py1)
    area_g = (gx2 - gx1) * (gy2 - gy1)
    iw = np.maximum(np.minimum(px2, gx2) - np.maximum(px1, gx1), 0.0)
    ih = np.maximum(np.minimum(py2, gy2) - np.maximum(py1, gy1), 0.0)
    inter = iw * ih
    union = area_p + area_g - inter
    iou = inter / (union + 1e-7)
    cw = np.maximum(px2, gx2) - np.minimum(px1, gx1)
    ch = np.maximum(py2, gy2) - np.minimum(py1, gy1)
    area_c = cw * ch
    giou = iou - (area_c - union) / (area_c + 1e-7)
    return scores, boxes, kpt_out, -giou


# ------------------------------------------------------------------
# Glue helpers
# ------------------------------------------------------------------

def _round_up(x, m):
    return ((x + m - 1) // m) * m


def _pad_axis(x, axis, size, value=0.0):
    pad = size - x.shape[axis]
    if pad <= 0:
        return x
    widths = [(0, 0)] * x.ndim
    widths[axis] = (0, pad)
    return jnp.pad(x, widths, constant_values=value)


def take_along_queries(x, idx):
    """x: (B, Q, ...), idx: (B, S) -> (B, S, ...) (== torch.gather on dim 1)."""
    extra = x.shape[2:]
    idx_full = idx.reshape(idx.shape + (1,) * len(extra))
    idx_full = jnp.broadcast_to(idx_full, idx.shape + extra)
    return jnp.take_along_axis(x, idx_full, axis=1)


def _greedy_assignment(cost):
    n_rows, n_cols = cost.shape
    rows, cols, pairs = list(range(n_rows)), list(range(n_cols)), []
    for _ in range(min(n_rows, n_cols)):
        sub = cost[np.ix_(rows, cols)]
        r, c = np.unravel_index(int(np.argmin(sub)), sub.shape)
        pairs.append((rows[r], cols[c]))
        del rows[r]
        del cols[c]
    pairs.sort()
    return (np.array([p[0] for p in pairs], dtype=np.int64),
            np.array([p[1] for p in pairs], dtype=np.int64))


def linear_sum_assignment_np(cost):
    cost = np.asarray(cost, dtype=np.float64)
    if _scipy_lsa is not None:
        r, c = _scipy_lsa(cost)
        return np.asarray(r), np.asarray(c)
    # TODO(synk): exact Hungarian fallback not implemented; greedy min-cost matching used.
    return _greedy_assignment(cost)


# ------------------------------------------------------------------
# PostProcess (JAX / Pallas version)
# ------------------------------------------------------------------

class PostProcess:
    def __init__(self, num_select=100, nms_iou_threshold=-1, num_body_points=17,
                 body_model=None):
        self.num_select = num_select
        self.nms_iou_threshold = nms_iou_threshold
        self.num_body_points = num_body_points
        # TODO(synk): build_body_model (GenderedSMPL) needs checkpoint files; in the
        # reference its regressed gt joints only feed cost_kp3d, which the matcher
        # discards, so the SMPL forward is skipped entirely here.
        self.body_model = None

    def forward(self, outputs, target_sizes, targets, data_batch_nc, device=None,
                not_to_xyxy=False, test=False):
        del device  # JAX manages device placement
        num_select = self.num_select
        nbp = self.num_body_points

        out_logits = outputs['pred_logits']
        out_bbox = outputs['pred_boxes']
        out_keypoints = outputs['pred_keypoints']
        out_smpl_pose = outputs['pred_smpl_pose']
        out_smpl_beta = outputs['pred_smpl_beta']
        out_smpl_cam = outputs['pred_smpl_cam']
        out_smpl_kp3d = outputs['pred_smpl_kp3d']

        B, Q, C = out_logits.shape
        assert B == target_sizes.shape[0]
        assert target_sizes.shape[1] == 2
        if test:
            assert not not_to_xyxy

        # top-k on raw logits (sigmoid is monotonic -> identical selection); the sigmoid
        # runs inside the fused Pallas kernel on the num_select selected values only.
        topk_logits, topk_indexes = jax.lax.top_k(
            out_logits.reshape(B, Q * C), num_select)
        topk_q = topk_indexes // C
        labels = topk_indexes % C

        # gather selected queries (XLA glue)
        boxes_g = take_along_queries(out_bbox, topk_q).astype(jnp.float32)
        kpts_g = take_along_queries(out_keypoints, topk_q).astype(jnp.float32)
        smpl_pose_g = take_along_queries(out_smpl_pose, topk_q)
        smpl_beta_g = take_along_queries(out_smpl_beta, topk_q)
        smpl_cam_g = take_along_queries(out_smpl_cam, topk_q)
        smpl_kp3d_g = take_along_queries(out_smpl_kp3d, topk_q)

        target_sizes = target_sizes.astype(jnp.float32)
        img_h = target_sizes[:, 0]
        img_w = target_sizes[:, 1]

        ns = num_select
        Np = _round_up(ns, 128)          # lane-dense pred dimension
        Dk = 3 * nbp
        Dk_pad = _round_up(Dk, 8)        # sublane-padded keypoint dims (51 -> 56)

        # fused-kernel inputs (f32, (8,128)-friendly layouts)
        logits_in = _pad_axis(topk_logits.astype(jnp.float32)[:, None, :], 2, Np)
        boxes_t = _pad_axis(jnp.transpose(boxes_g, (0, 2, 1)), 2, Np)        # (B, 4, Np)
        bscale = jnp.stack([img_w, img_h, img_w, img_h], axis=1)[:, :, None]  # (B, 4, 1)

        kpts_in = _pad_axis(_pad_axis(jnp.transpose(kpts_g, (0, 2, 1)), 1, Dk_pad), 2, Np)
        kscale = jnp.concatenate(
            [jnp.tile(jnp.stack([img_w, img_h], axis=1), (1, nbp)),
             jnp.ones((B, nbp), jnp.float32)], axis=1)                       # (B, Dk)
        kscale = _pad_axis(kscale, 1, Dk_pad)[:, :, None]                     # (B, Dk_pad, 1)

        # gt boxes (xywh -> xyxy) stacked per image, padded to Gm_pad (multiple of 8)
        tgt_kp3d_list = data_batch_nc['keypoints3d_smpl']
        g_counts = [int(x.shape[0]) for x in tgt_kp3d_list]
        Gm_pad = _round_up(max(g_counts), 8)
        gt_box_rows, gt_box_xyxy = [], []
        for i in range(B):
            bb = jnp.asarray(data_batch_nc['bbox_xywh'][i], jnp.float32)[..., :4]
            bb_xyxy = jnp.concatenate([bb[:, 0:2], bb[:, 0:2] + bb[:, 2:4]], axis=1)
            gt_box_xyxy.append(bb_xyxy)
            gt_box_rows.append(_pad_axis(bb_xyxy, 0, Gm_pad))                 # (Gm_pad, 4)
        gt_box_in = jnp.stack(gt_box_rows, axis=0)                            # (B, Gm_pad, 4)

        # one fused, batched Pallas kernel
        scores_o, boxes_o, kpts_o, cost_giou_o = fused_postprocess_pallas(
            logits_in, boxes_t, bscale, kpts_in, kscale, gt_box_in,
            to_xyxy=not not_to_xyxy, test=test)
        device_outputs = (scores_o, boxes_o, kpts_o, cost_giou_o)

        tgt_pose_list = [
            jnp.concatenate(
                [jnp.asarray(data_batch_nc['smpl_global_orient'][i],
                             jnp.float32)[:, None, :],
                 jnp.asarray(data_batch_nc['smpl_body_pose'][i], jnp.float32)],
                axis=-2)
            for i in range(B)]

        # single device -> host transfer for everything the matcher / assembly needs
        host = jax.device_get(dict(
            scores=scores_o, boxes=boxes_o, kpts=kpts_o, cost_giou=cost_giou_o,
            labels=labels,
            smpl_pose=smpl_pose_g, smpl_beta=smpl_beta_g,
            smpl_cam=smpl_cam_g, smpl_kp3d=smpl_kp3d_g,
            gt_kp3d=list(tgt_kp3d_list), gt_pose=tgt_pose_list,
            gt_beta=list(data_batch_nc['smpl_betas']),
            gt_kpt2d=list(data_batch_nc['keypoints2d_ori']),
            gt_box_xyxy=gt_box_xyxy,
            image_id=[targets[i]['image_id'] for i in range(B)],
        ))

        scores_np = host['scores'][:, 0, :ns]
        labels_np = host['labels']
        boxes_np = np.transpose(host['boxes'][:, :, :ns], (0, 2, 1))          # (B, ns, 4)
        kpts_scaled = np.transpose(host['kpts'][:, :Dk, :ns], (0, 2, 1))      # (B, ns, Dk)
        Z = kpts_scaled[:, :, :2 * nbp].reshape(B, ns, nbp, 2)
        V = kpts_scaled[:, :, 2 * nbp:].reshape(B, ns, nbp, 1)
        keypoints_res = np.concatenate([Z, V], axis=-1).reshape(B, ns, Dk)

        indices = []
        pred_scores, pred_labels, pred_boxes, pred_keypoints = [], [], [], []
        pred_smpl_pose, pred_smpl_beta, pred_smpl_cam, pred_smpl_kp3d = [], [], [], []
        gt_smpl_kp3d, gt_smpl_pose, gt_smpl_beta = [], [], []
        gt_boxes, gt_keypoints, image_idx = [], [], []
        gt_bbox_last = None
        for i in range(B):
            gi = g_counts[i]
            cost_giou = host['cost_giou'][i, :gi, :ns].T                      # (ns, gi)
            pred_ind, gt_ind = linear_sum_assignment_np(cost_giou)
            indices.append((pred_ind, gt_ind))

            pred_scores.append(scores_np[i][pred_ind])
            pred_labels.append(labels_np[i][pred_ind])
            pred_boxes.append(boxes_np[i][pred_ind])
            pred_keypoints.append(keypoints_res[i][pred_ind])
            pred_smpl_kp3d.append(host['smpl_kp3d'][i][pred_ind])
            pred_smpl_pose.append(host['smpl_pose'][i][pred_ind])
            pred_smpl_beta.append(host['smpl_beta'][i][pred_ind])
            pred_smpl_cam.append(host['smpl_cam'][i][pred_ind])
            gt_smpl_kp3d.append(host['gt_kp3d'][i][gt_ind])
            gt_smpl_pose.append(host['gt_pose'][i][gt_ind])
            gt_smpl_beta.append(host['gt_beta'][i][gt_ind])
            gt_boxes.append(host['gt_box_xyxy'][i][gt_ind])
            gt_keypoints.append(host['gt_kpt2d'][i][gt_ind])
            image_idx.append(host['image_id'][i])
            gt_bbox_last = host['gt_box_xyxy'][i]

        results = [{
            'scores': pred_scores, 'labels': pred_labels, 'boxes': pred_boxes,
            'keypoints': pred_keypoints,
            'pred_smpl_pose': pred_smpl_pose, 'pred_smpl_beta': pred_smpl_beta,
            'pred_smpl_cam': pred_smpl_cam, 'pred_smpl_kp3d': pred_smpl_kp3d,
            'gt_smpl_pose': gt_smpl_pose, 'gt_smpl_beta': gt_smpl_beta,
            'gt_smpl_kp3d': gt_smpl_kp3d,
            # NOTE: mirrors the reference, which stores the *last* image's gt bbox here.
            'gt_boxes': gt_bbox_last,
            'gt_keypoints': gt_keypoints, 'image_idx': image_idx,
        }]
        if self.nms_iou_threshold > 0:
            raise NotImplementedError
        return results, device_outputs

    __call__ = forward


# ------------------------------------------------------------------
# Main
# ------------------------------------------------------------------

if __name__ == "__main__":
    key = jax.random.PRNGKey(0)
    ks = list(jax.random.split(key, 40))

    B, Q, C = 2, 64, 2
    num_select = 16
    nbp = 17          # num_body_points
    K3D = 17          # smpl 3D joints
    G = 2             # gt instances per image

    # ---------- standalone validation of the fused Pallas kernel vs numpy ----------
    Np, Dk_pad, Gm_pad = 128, 56, 8
    t_logits = jax.random.normal(ks[30], (B, 1, Np), jnp.float32)
    t_boxes = jax.random.uniform(ks[31], (B, 4, Np), jnp.float32, 0.2, 0.6)
    t_bscale = jnp.array([[192.0, 256.0, 192.0, 256.0],
                          [256.0, 256.0, 256.0, 256.0]], jnp.float32)[:, :, None]
    t_kpts = jax.random.uniform(ks[32], (B, Dk_pad, Np), jnp.float32)
    t_kscale = jax.random.uniform(ks[33], (B, Dk_pad, 1), jnp.float32, 1.0, 200.0)
    gx1 = jax.random.uniform(ks[36], (B, Gm_pad, 1), jnp.float32, 0.0, 100.0)
    gy1 = jax.random.uniform(ks[37], (B, Gm_pad, 1), jnp.float32, 0.0, 100.0)
    gx2 = gx1 + jax.random.uniform(ks[38], (B, Gm_pad, 1), jnp.float32, 20.0, 120.0)
    gy2 = gy1 + jax.random.uniform(ks[39], (B, Gm_pad, 1), jnp.float32, 20.0, 120.0)
    t_gbox = jnp.concatenate([gx1, gy1, gx2, gy2], axis=2)     # (B, Gm_pad, 4)

    ref = _fused_reference(t_logits, t_boxes, t_bscale, t_kpts, t_kscale, t_gbox)
    for collapse in (False, True):   # validate both the gridded and the collapsed path
        kout = fused_postprocess_pallas(t_logits, t_boxes, t_bscale, t_kpts, t_kscale,
                                        t_gbox, collapse_batch=collapse)
        jax.block_until_ready(kout)
        np.testing.assert_allclose(np.asarray(kout[0]), ref[0], rtol=1e-5, atol=1e-5)
        np.testing.assert_allclose(np.asarray(kout[1]), ref[1], rtol=1e-5, atol=1e-3)
        np.testing.assert_allclose(np.asarray(kout[2]), ref[2], rtol=1e-5, atol=1e-3)
        np.testing.assert_allclose(np.asarray(kout[3]), ref[3], rtol=1e-4, atol=5e-4)

    # --------------------------- end-to-end module forward ---------------------------
    outputs = {
        'pred_logits': jax.random.normal(ks[0], (B, Q, C), jnp.float32),
        'pred_boxes': jax.random.uniform(ks[1], (B, Q, 4), jnp.float32, 0.2, 0.6),
        'pred_keypoints': jax.random.uniform(ks[2], (B, Q, nbp * 3), jnp.float32),
        'pred_smpl_pose': 0.1 * jax.random.normal(ks[3], (B, Q, 24, 3, 3), jnp.float32),
        'pred_smpl_beta': 0.1 * jax.random.normal(ks[4], (B, Q, 10), jnp.float32),
        'pred_smpl_cam': jax.random.normal(ks[5], (B, Q, 3), jnp.float32),
        'pred_smpl_kp3d': jax.random.normal(ks[6], (B, Q, K3D, 3), jnp.float32),
    }
    target_sizes = jnp.array([[256.0, 192.0], [256.0, 256.0]], jnp.float32)  # (h, w)
    targets = [{'image_id': jnp.array([7], jnp.int32)},
               {'image_id': jnp.array([11], jnp.int32)}]

    def _gt_kp3d(k):
        xyz = jax.random.normal(k, (G, K3D, 3), jnp.float32)
        conf = jnp.ones((G, K3D, 1), jnp.float32)
        return jnp.concatenate([xyz, conf], axis=-1)

    def _gt_bbox(k):
        k1, k2 = jax.random.split(k)
        xy = jax.random.uniform(k1, (G, 2), jnp.float32, 0.0, 100.0)
        wh = jax.random.uniform(k2, (G, 2), jnp.float32, 30.0, 120.0)
        return jnp.concatenate([xy, wh], axis=-1)

    data_batch_nc = {
        'keypoints3d_smpl': [_gt_kp3d(ks[7]), _gt_kp3d(ks[8])],
        'smpl_global_orient': [0.1 * jax.random.normal(ks[9], (G, 3), jnp.float32),
                               0.1 * jax.random.normal(ks[10], (G, 3), jnp.float32)],
        'smpl_body_pose': [0.1 * jax.random.normal(ks[11], (G, 23, 3), jnp.float32),
                           0.1 * jax.random.normal(ks[12], (G, 23, 3), jnp.float32)],
        'smpl_betas': [0.1 * jax.random.normal(ks[13], (G, 10), jnp.float32),
                       0.1 * jax.random.normal(ks[14], (G, 10), jnp.float32)],
        'keypoints2d_ori': [jax.random.uniform(ks[15], (G, nbp, 3), jnp.float32),
                            jax.random.uniform(ks[16], (G, nbp, 3), jnp.float32)],
        'bbox_xywh': [_gt_bbox(ks[17]), _gt_bbox(ks[18])],
    }

    post = PostProcess(num_select=num_select, num_body_points=nbp)
    results, dev_out = post.forward(outputs, target_sizes, targets, data_batch_nc,
                                    device=None)
    jax.block_until_ready(dev_out)

    assert len(results) == 1
    res = results[0]
    n_match = min(num_select, G)
    assert len(res['scores']) == B and len(res['boxes']) == B
    assert res['scores'][0].shape == (n_match,)
    assert res['boxes'][0].shape == (n_match, 4)
    assert res['keypoints'][0].shape == (n_match, nbp * 3)
    assert res['pred_smpl_pose'][0].shape == (n_match, 24, 3, 3)
    assert res['pred_smpl_kp3d'][0].shape == (n_match, K3D, 3)
    assert res['gt_smpl_kp3d'][0].shape == (n_match, K3D, 4)
    print("KERNEL_OK")
</pallas_src>

<mosaic_0001>
module attributes {stable_mosaic.version = 11 : i64} {
  func.func @_postprocess_fused_kernel(%arg0: i32, %arg1: memref<1x1x128xf32, #tpu.memory_space<vmem>>, %arg2: memref<1x4x128xf32, #tpu.memory_space<vmem>>, %arg3: memref<1x4x1xf32, #tpu.memory_space<vmem>>, %arg4: memref<1x56x128xf32, #tpu.memory_space<vmem>>, %arg5: memref<1x56x1xf32, #tpu.memory_space<vmem>>, %arg6: memref<1x8x4xf32, #tpu.memory_space<vmem>>, %arg7: memref<1x1x128xf32, #tpu.memory_space<vmem>>, %arg8: memref<1x4x128xf32, #tpu.memory_space<vmem>>, %arg9: memref<1x56x128xf32, #tpu.memory_space<vmem>>, %arg10: memref<1x8x128xf32, #tpu.memory_space<vmem>>) attributes {dimension_semantics = [#tpu.dimension_semantics<parallel>], iteration_bounds = array<i64: 2>, scalar_prefetch = 0 : i64, scratch_operands = 0 : i64, tpu.core_type = #tpu.core_type<tc>, window_params = [{transform_indices = @transform_0, window_bounds = array<i64: 1, 1, 128>}, {transform_indices = @transform_1, window_bounds = array<i64: 1, 4, 128>}, {transform_indices = @transform_2, window_bounds = array<i64: 1, 4, 1>}, {transform_indices = @transform_3, window_bounds = array<i64: 1, 56, 128>}, {transform_indices = @transform_4, window_bounds = array<i64: 1, 56, 1>}, {transform_indices = @transform_5, window_bounds = array<i64: 1, 8, 4>}, {transform_indices = @transform_6, window_bounds = array<i64: 1, 1, 128>}, {transform_indices = @transform_7, window_bounds = array<i64: 1, 4, 128>}, {transform_indices = @transform_8, window_bounds = array<i64: 1, 56, 128>}, {transform_indices = @transform_9, window_bounds = array<i64: 1, 8, 128>}]} {
    %c0 = arith.constant 0 : index
    %c0_0 = arith.constant 0 : index
    %c0_1 = arith.constant 0 : index
    %0 = vector.load %arg1[%c0, %c0_0, %c0_1] : memref<1x1x128xf32, #tpu.memory_space<vmem>>, vector<1x1x128xf32>
    %cst = arith.constant 0.000000e+00 : f32
    %1 = vector.broadcast %cst : f32 to vector<1x1x128xf32>
    %2 = arith.subf %1, %0 : vector<1x1x128xf32>
    %3 = math.exp %2 : vector<1x1x128xf32>
    %cst_2 = arith.constant 1.000000e+00 : f32
    %4 = vector.broadcast %cst_2 : f32 to vector<1x1x128xf32>
    %5 = arith.addf %4, %3 : vector<1x1x128xf32>
    %6 = tpu.reciprocal %5 {approx = true} : vector<1x1x128xf32> -> vector<1x1x128xf32>
    %7 = arith.mulf %5, %6 : vector<1x1x128xf32>
    %cst_3 = arith.constant 2.000000e+00 : f32
    %8 = vector.broadcast %cst_3 : f32 to vector<1x1x128xf32>
    %9 = arith.subf %8, %7 : vector<1x1x128xf32>
    %10 = arith.mulf %6, %9 : vector<1x1x128xf32>
    %c0_4 = arith.constant 0 : index
    %c0_5 = arith.constant 0 : index
    %c0_6 = arith.constant 0 : index
    %11 = vector.load %arg7[%c0_4, %c0_5, %c0_6] : memref<1x1x128xf32, #tpu.memory_space<vmem>>, vector<1x1x128xf32>
    tpu.vector_store %arg7[%c0_4, %c0_5, %c0_6], %10 {strides = array<i32>} : memref<1x1x128xf32, #tpu.memory_space<vmem>>, vector<1x1x128xf32>,
    %c0_7 = arith.constant 0 : index
    %c0_8 = arith.constant 0 : index
    %c0_9 = arith.constant 0 : index
    %12 = vector.load %arg4[%c0_7, %c0_8, %c0_9] : memref<1x56x128xf32, #tpu.memory_space<vmem>>, vector<1x56x128xf32>
    %c0_10 = arith.constant 0 : index
    %c0_11 = arith.constant 0 : index
    %c0_12 = arith.constant 0 : index
    %13 = vector.load %arg5[%c0_10, %c0_11, %c0_12] : memref<1x56x1xf32, #tpu.memory_space<vmem>>, vector<1x56x1xf32>
    %14 = vector.broadcast %13 : vector<1x56x1xf32> to vector<1x56x128xf32>
    %15 = arith.mulf %12, %14 : vector<1x56x128xf32>
    %c0_13 = arith.constant 0 : index
    %c0_14 = arith.constant 0 : index
    %c0_15 = arith.constant 0 : index
    %16 = vector.load %arg9[%c0_13, %c0_14, %c0_15] : memref<1x56x128xf32, #tpu.memory_space<vmem>>, vector<1x56x128xf32>
    tpu.vector_store %arg9[%c0_13, %c0_14, %c0_15], %15 {strides = array<i32>} : memref<1x56x128xf32, #tpu.memory_space<vmem>>, vector<1x56x128xf32>,
    %c0_16 = arith.constant 0 : index
    %c0_17 = arith.constant 0 : index
    %c0_18 = arith.constant 0 : index
    %17 = vector.load %arg2[%c0_16, %c0_17, %c0_18] : memref<1x4x128xf32, #tpu.memory_space<vmem>>, vector<1x4x128xf32>
    %c0_19 = arith.constant 0 : index
    %c0_20 = arith.constant 0 : index
    %c0_21 = arith.constant 0 : index
    %18 = vector.load %arg3[%c0_19, %c0_20, %c0_21] : memref<1x4x1xf32, #tpu.memory_space<vmem>>, vector<1x4x1xf32>
    %19 = vector.broadcast %18 : vector<1x4x1xf32> to vector<1x4x128xf32>
    %20 = arith.mulf %17, %19 : vector<1x4x128xf32>
    %21 = vector.extract_strided_slice %20 {offsets = [0, 0, 0], sizes = [1, 1, 128], strides = [1, 1, 1]} : vector<1x4x128xf32> to vector<1x1x128xf32>
    %22 = vector.extract_strided_slice %20 {offsets = [0, 1, 0], sizes = [1, 1, 128], strides = [1, 1, 1]} : vector<1x4x128xf32> to vector<1x1x128xf32>
    %23 = vector.extract_strided_slice %20 {offsets = [0, 2, 0], sizes = [1, 1, 128], strides = [1, 1, 1]} : vector<1x4x128xf32> to vector<1x1x128xf32>
    %cst_22 = arith.constant 5.000000e-01 : f32
    %24 = vector.broadcast %cst_22 : f32 to vector<1x1x128xf32>
    %25 = arith.mulf %24, %23 : vector<1x1x128xf32>
    %26 = vector.extract_strided_slice %20 {offsets = [0, 3, 0], sizes = [1, 1, 128], strides = [1, 1, 1]} : vector<1x4x128xf32> to vector<1x1x128xf32>
    %cst_23 = arith.constant 5.000000e-01 : f32
    %27 = vector.broadcast %cst_23 : f32 to vector<1x1x128xf32>
    %28 = arith.mulf %27, %26 : vector<1x1x128xf32>
    %29 = arith.subf %21, %25 : vector<1x1x128xf32>
    %30 = arith.subf %22, %28 : vector<1x1x128xf32>
    %31 = arith.addf %21, %25 : vector<1x1x128xf32>
    %32 = arith.addf %22, %28 : vector<1x1x128xf32>
    %33 = tpu.concatenate %29, %30, %31, %32 in 1 : vector<1x1x128xf32>, vector<1x1x128xf32>, vector<1x1x128xf32>, vector<1x1x128xf32> -> vector<1x4x128xf32>
    %c0_24 = arith.constant 0 : index
    %c0_25 = arith.constant 0 : index
    %c0_26 = arith.constant 0 : index
    %34 = vector.load %arg8[%c0_24, %c0_25, %c0_26] : memref<1x4x128xf32, #tpu.memory_space<vmem>>, vector<1x4x128xf32>
    tpu.vector_store %arg8[%c0_24, %c0_25, %c0_26], %33 {strides = array<i32>} : memref<1x4x128xf32, #tpu.memory_space<vmem>>, vector<1x4x128xf32>,
    %c0_27 = arith.constant 0 : index
    %c0_28 = arith.constant 0 : index
    %c0_29 = arith.constant 0 : index
    %35 = vector.load %arg6[%c0_27, %c0_28, %c0_29] : memref<1x8x4xf32, #tpu.memory_space<vmem>>, vector<1x8x4xf32>
    %36 = vector.shape_cast %29 : vector<1x1x128xf32> to vector<1x1x128xf32>
    %37 = vector.broadcast %36 : vector<1x1x128xf32> to vector<1x8x128xf32>
    %38 = vector.shape_cast %30 : vector<1x1x128xf32> to vector<1x1x128xf32>
    %39 = vector.broadcast %38 : vector<1x1x128xf32> to vector<1x8x128xf32>
    %40 = vector.shape_cast %31 : vector<1x1x128xf32> to vector<1x1x128xf32>
    %41 = vector.broadcast %40 : vector<1x1x128xf32> to vector<1x8x128xf32>
    %42 = vector.shape_cast %32 : vector<1x1x128xf32> to vector<1x1x128xf32>
    %43 = vector.broadcast %42 : vector<1x1x128xf32> to vector<1x8x128xf32>
    %44 = vector.extract_strided_slice %35 {offsets = [0, 0, 0], sizes = [1, 8, 1], strides = [1, 1, 1]} : vector<1x8x4xf32> to vector<1x8x1xf32>
    %45 = vector.shape_cast %44 : vector<1x8x1xf32> to vector<1x8x1xf32>
    %46 = vector.broadcast %45 : vector<1x8x1xf32> to vector<1x8x128xf32>
    %47 = vector.extract_strided_slice %35 {offsets = [0, 0, 1], sizes = [1, 8, 1], strides = [1, 1, 1]} : vector<1x8x4xf32> to vector<1x8x1xf32>
    %48 = vector.shape_cast %47 : vector<1x8x1xf32> to vector<1x8x1xf32>
    %49 = vector.broadcast %48 : vector<1x8x1xf32> to vector<1x8x128xf32>
    %50 = vector.extract_strided_slice %35 {offsets = [0, 0, 2], sizes = [1, 8, 1], strides = [1, 1, 1]} : vector<1x8x4xf32> to vector<1x8x1xf32>
    %51 = vector.shape_cast %50 : vector<1x8x1xf32> to vector<1x8x1xf32>
    %52 = vector.broadcast %51 : vector<1x8x1xf32> to vector<1x8x128xf32>
    %53 = vector.extract_strided_slice %35 {offsets = [0, 0, 3], sizes = [1, 8, 1], strides = [1, 1, 1]} : vector<1x8x4xf32> to vector<1x8x1xf32>
    %54 = vector.shape_cast %53 : vector<1x8x1xf32> to vector<1x8x1xf32>
    %55 = vector.broadcast %54 : vector<1x8x1xf32> to vector<1x8x128xf32>
    %56 = arith.subf %41, %37 : vector<1x8x128xf32>
    %57 = arith.subf %43, %39 : vector<1x8x128xf32>
    %58 = arith.mulf %56, %57 : vector<1x8x128xf32>
    %59 = arith.subf %52, %46 : vector<1x8x128xf32>
    %60 = arith.subf %55, %49 : vector<1x8x128xf32>
    %61 = arith.mulf %59, %60 : vector<1x8x128xf32>
    %62 = arith.minimumf %41, %52 : vector<1x8x128xf32>
    %63 = arith.maximumf %37, %46 : vector<1x8x128xf32>
    %64 = arith.subf %62, %63 : vector<1x8x128xf32>
    %cst_30 = arith.constant 0.000000e+00 : f32
    %65 = vector.broadcast %cst_30 : f32 to vector<1x8x128xf32>
    %66 = arith.maximumf %64, %65 : vector<1x8x128xf32>
    %67 = arith.minimumf %43, %55 : vector<1x8x128xf32>
    %68 = arith.maximumf %39, %49 : vector<1x8x128xf32>
    %69 = arith.subf %67, %68 : vector<1x8x128xf32>
    %cst_31 = arith.constant 0.000000e+00 : f32
    %70 = vector.broadcast %cst_31 : f32 to vector<1x8x128xf32>
    %71 = arith.maximumf %69, %70 : vector<1x8x128xf32>
    %72 = arith.mulf %66, %71 : vector<1x8x128xf32>
    %73 = arith.addf %58, %61 : vector<1x8x128xf32>
    %74 = arith.subf %73, %72 : vector<1x8x128xf32>
    %cst_32 = arith.constant 1.000000e-07 : f32
    %75 = vector.broadcast %cst_32 : f32 to vector<1x8x128xf32>
    %76 = arith.addf %74, %75 : vector<1x8x128xf32>
    %77 = tpu.reciprocal %76 {approx = true} : vector<1x8x128xf32> -> vector<1x8x128xf32>
    %78 = arith.mulf %76, %77 : vector<1x8x128xf32>
    %cst_33 = arith.constant 2.000000e+00 : f32
    %79 = vector.broadcast %cst_33 : f32 to vector<1x8x128xf32>
    %80 = arith.subf %79, %78 : vector<1x8x128xf32>
    %81 = arith.mulf %77, %80 : vector<1x8x128xf32>
    %82 = arith.mulf %72, %81 : vector<1x8x128xf32>
    %83 = arith.maximumf %41, %52 : vector<1x8x128xf32>
    %84 = arith.minimumf %37, %46 : vector<1x8x128xf32>
    %85 = arith.subf %83, %84 : vector<1x8x128xf32>
    %86 = arith.maximumf %43, %55 : vector<1x8x128xf32>
    %87 = arith.minimumf %39, %49 : vector<1x8x128xf32>
    %88 = arith.subf %86, %87 : vector<1x8x128xf32>
    %89 = arith.mulf %85, %88 : vector<1x8x128xf32>
    %90 = arith.subf %89, %74 : vector<1x8x128xf32>
    %cst_34 = arith.constant 1.000000e-07 : f32
    %91 = vector.broadcast %cst_34 : f32 to vector<1x8x128xf32>
    %92 = arith.addf %89, %91 : vector<1x8x128xf32>
    %93 = tpu.reciprocal %92 {approx = true} : vector<1x8x128xf32> -> vector<1x8x128xf32>
    %94 = arith.mulf %92, %93 : vector<1x8x128xf32>
    %cst_35 = arith.constant 2.000000e+00 : f32
    %95 = vector.broadcast %cst_35 : f32 to vector<1x8x128xf32>
    %96 = arith.subf %95, %94 : vector<1x8x128xf32>
    %97 = arith.mulf %93, %96 : vector<1x8x128xf32>
    %98 = arith.mulf %90, %97 : vector<1x8x128xf32>
    %99 = arith.subf %82, %98 : vector<1x8x128xf32>
    %cst_36 = arith.constant 0.000000e+00 : f32
    %100 = vector.broadcast %cst_36 : f32 to vector<1x8x128xf32>
    %101 = arith.subf %100, %99 : vector<1x8x128xf32>
    %c0_37 = arith.constant 0 : index
    %c0_38 = arith.constant 0 : index
    %c0_39 = arith.constant 0 : index
    %102 = vector.load %arg10[%c0_37, %c0_38, %c0_39] : memref<1x8x128xf32, #tpu.memory_space<vmem>>, vector<1x8x128xf32>
    tpu.vector_store %arg10[%c0_37, %c0_38, %c0_39], %101 {strides = array<i32>} : memref<1x8x128xf32, #tpu.memory_space<vmem>>, vector<1x8x128xf32>,
    return
  }
  func.func @transform_0(%arg0: i32) -> (i32, i32, i32) {
    %c0_i32 = arith.constant 0 : i32
    %c0_i32_0 = arith.constant 0 : i32
    %c0_i32_1 = arith.constant 0 : i32
    return %arg0, %c0_i32, %c0_i32_0 : i32, i32, i32
  }
  func.func @transform_1(%arg0: i32) -> (i32, i32, i32) {
    %c0_i32 = arith.constant 0 : i32
    %c0_i32_0 = arith.constant 0 : i32
    %c0_i32_1 = arith.constant 0 : i32
    return %arg0, %c0_i32, %c0_i32_0 : i32, i32, i32
  }
  func.func @transform_2(%arg0: i32) -> (i32, i32, i32) {
    %c0_i32 = arith.constant 0 : i32
    %c0_i32_0 = arith.constant 0 : i32
    %c0_i32_1 = arith.constant 0 : i32
    return %arg0, %c0_i32, %c0_i32_0 : i32, i32, i32
  }
  func.func @transform_3(%arg0: i32) -> (i32, i32, i32) {
    %c0_i32 = arith.constant 0 : i32
    %c0_i32_0 = arith.constant 0 : i32
    %c0_i32_1 = arith.constant 0 : i32
    return %arg0, %c0_i32, %c0_i32_0 : i32, i32, i32
  }
  func.func @transform_4(%arg0: i32) -> (i32, i32, i32) {
    %c0_i32 = arith.constant 0 : i32
    %c0_i32_0 = arith.constant 0 : i32
    %c0_i32_1 = arith.constant 0 : i32
    return %arg0, %c0_i32, %c0_i32_0 : i32, i32, i32
  }
  func.func @transform_5(%arg0: i32) -> (i32, i32, i32) {
    %c0_i32 = arith.constant 0 : i32
    %c0_i32_0 = arith.constant 0 : i32
    %c0_i32_1 = arith.constant 0 : i32
    return %arg0, %c0_i32, %c0_i32_0 : i32, i32, i32
  }
  func.func @transform_6(%arg0: i32) -> (i32, i32, i32) {
    %c0_i32 = arith.constant 0 : i32
    %c0_i32_0 = arith.constant 0 : i32
    %c0_i32_1 = arith.constant 0 : i32
    return %arg0, %c0_i32, %c0_i32_0 : i32, i32, i32
  }
  func.func @transform_7(%arg0: i32) -> (i32, i32, i32) {
    %c0_i32 = arith.constant 0 : i32
    %c0_i32_0 = arith.constant 0 : i32
    %c0_i32_1 = arith.constant 0 : i32
    return %arg0, %c0_i32, %c0_i32_0 : i32, i32, i32
  }
  func.func @transform_8(%arg0: i32) -> (i32, i32, i32) {
    %c0_i32 = arith.constant 0 : i32
    %c0_i32_0 = arith.constant 0 : i32
    %c0_i32_1 = arith.constant 0 : i32
    return %arg0, %c0_i32, %c0_i32_0 : i32, i32, i32
  }
  func.func @transform_9(%arg0: i32) -> (i32, i32, i32) {
    %c0_i32 = arith.constant 0 : i32
    %c0_i32_0 = arith.constant 0 : i32
    %c0_i32_1 = arith.constant 0 : i32
    return %arg0, %c0_i32, %c0_i32_0 : i32, i32, i32
  }
}

</mosaic_0001>

<bundles_post_ra>
// kernel: tpu_custom_call.1
= control target key start
LH: loop header
LB: loop body
LE: loop exit
PB: predicated region body
PF: predicated region fallthrough
CT: control target
= control target key end

     0   :  { %s1462_s0 = inlined_call_operand.vmem [shape: f32[2,1,128], index: 0, kind: input, shape index: {}]   ;;  %s1463_s1 = inlined_call_operand.vmem [shape: f32[2,4,128], index: 1, kind: input, shape index: {}]   ;;  %s1464_s2 = inlined_call_operand.vmem [shape: f32[2,4,1], index: 2, kind: input, shape index: {}]   ;;  %s1465_s3 = inlined_call_operand.vmem [shape: f32[2,56,128], index: 3, kind: input, shape index: {}]   ;;  %s1466_s4 = inlined_call_operand.vmem [shape: f32[2,56,1], index: 4, kind: input, shape index: {}]   ;;  %s1467_s5 = inlined_call_operand.vmem [shape: f32[2,8,4], index: 5, kind: input, shape index: {}]   ;;  %s1468_s6 = inlined_call_operand.hbm [shape: f32[2,1,128], index: 6, kind: output, shape index: {0}]   ;;  %s1469_s7 = inlined_call_operand.hbm [shape: f32[2,4,128], index: 7, kind: output, shape index: {1}]   ;;  %s1470_s8 = inlined_call_operand.hbm [shape: f32[2,56,128], index: 8, kind: output, shape index: {2}]   ;;  %s1471_s9 = inlined_call_operand.hbm [shape: f32[2,8,128], index: 9, kind: output, shape index: {3}]  }
   0x1   :  { %1475 = sst [smem:[#allocation12_spill]] %s1462_s0 }
   0x2   :  { %1476 = sst [smem:[#allocation13_spill]] %s1463_s1 }
   0x3   :  { %15 = vsyncpa [#allocation3], 0 }
   0x4   :  { %17 = vsyncpa [#allocation3 + $0x1], 0 }
   0x5   :  { %18 = vsyncpa [#allocation5], 0 }
   0x6   :  { %20 = vsyncpa [#allocation5 + $0x1], 0 }
   0x7   :  { %21 = vsyncpa [#allocation8], 0 }
   0x8   :  { %23 = vsyncpa [#allocation8 + $0x1], 0  ;;  %s1200_s30 = smov 0   ;;  %s1202_s10 = smov 0  }
   0x9   :  { %s1204_s11 = smov 0   ;;  %s1206_s12 = smov 0  }
   0xa LB: > { %s1221_s13 = sadd.s32 4294967295, %s1138_s12   ;;  %s1472_s14 = sadd.s32 4294967294, %s1138_s12   ;;  %s1138_s12 = sphi %s1206_s12, %s1487_s12   ;;  %s1134_s11 = sphi %s1204_s11, %s1486_s11   ;;  %s1130_s10 = sphi %s1202_s10, %s1485_s10   ;;  %s1126_s30 = sphi %s1200_s30, %s1484_s30  }
   0xb   : > { %s1225_s15 = sadd.s32 1, %s1138_s12   ;;  %s192_s16 = sadd.s32 1, %s1134_s11 }
   0xc   : > { %s189_s17 = ssub.s32 %s1138_s12, %s1225_s15  ;;  %p202_p0 = scmp.ne.s32.totalorder %s1134_s11, %s1130_s10 }
   0xd   : > { %p190_p1 = scmp.eq.s32.totalorder %s189_s17, 0  ;;  %p203_p2 = scmp.eq.s32.totalorder %s1221_s13, 1 }
   0xe   : > { %p208_p3 = scmp.ne.s32.totalorder %s1130_s10, %s1126_s30  ;;  %p209_p4 = scmp.eq.s32.totalorder %s1472_s14, 1 }
   0xf   : > { %s1238_s18 = scalar_select %p190_p1, %s1134_s11, %s192_s16  }
  0x10   : > { %p1240_p5 = por %p203_p2, %p202_p0  ;;  %p1244_p6 = por %p209_p4, %p208_p3 }
  0x11   : > { %p890_p7 = scmp.ge.s32.totalorder %s1138_s12, 1  ;;  %p348_p8 = scmp.lt.s32.totalorder %s1138_s12, 3 }
  0x13   : > { %p349_p9 = pnand %p890_p7, %p348_p8 }
  0x14   : > { %p418_p10 = scmp.lt.s32.totalorder (!%p349_p9), %s1221_s13, 1  ;;  %v1140_v0 = vmov (!%p349_p9), 1   ;;  %v1141_v1 = vmov (!%p349_p9), 0   ;;  %v1142_v4 = vmov (!%p349_p9), 2   ;;  %v1143_v6 = vmov (!%p349_p9), 3   ;;  %s1479_s0 = sld [smem:[#allocation12_spill]] (!%p349_p9) }
  0x15   : > { %352 = sbr.rel (%p349_p9) target bundleno = 244 (0xf4), region = 44  ;;  %970 = vset.pattern.permute.xlu1 (!%p349_p9), %v1140_v0  ;;  %969 = vset.pattern.permute.xlu0 (!%p349_p9), %v1141_v1  ;;  %s1275_s14 = sand.u32 (!%p349_p9), 1, %s1130_s10  }
  0x16   : > { %s900_s27 = sshll.u32 (!%p349_p9), %s1221_s13, 4  ;;  %s396_s28 = scalar_lea.vmem (!%p349_p9), [#allocation2], %s1275_s14 }
  0x17   : > { %s613_s25 = scalar_lea.sflag (!%p349_p9), [#allocation3], %s1275_s14 }
  0x1c   : > { %s1252_s21 = scalar_select %p418_p10, %s1221_s13, 1 }
  0x1e   : > { %s897_s22 = sshll.u32 %s1252_s21, 3  ;;  %s1474_s23 = sshll.u32 %s1252_s21, 2 }
  0x1f   : > { %s442_s26 = scalar_lea.vmem %s1467_s5, %s897_s22  ;;  %s428_s29 = scalar_lea.vmem %s1464_s2, %s1474_s23 }
  0x20   : > { %v538_v2 = vld [vmem:[%s442_s26] sm:$0xff]  ;;  %s1473_s16 = smul.u32 56, %s1252_s21  ;;  %s420_s26 = scalar_lea.vmem %s1479_s0, %s1252_s21 }
  0x21   : > { %v517_v3 = vld [vmem:[%s428_s29] sm:$0xf]  ;;  %561 = vperm.xlu1 %970, %v538_v2   ;;  %s640_s29 = sshll.u32 %s396_s28, 4  ;;  %s1284_s29 = int_to_ptr.vmem [resolvable:$true] %s640_s29 }
  0x22   : > { %520 = vperm.xlu0 %969, %v517_v3   ;;  %s438_s24 = scalar_lea.vmem %s1466_s4, %s1473_s16  ;;  %v443_v9 = vld [vmem:[%s420_s26] sm:$0x1]  ;;  %s984_s26 = scalar_lea.vmem %s1284_s29, 16 }
  0x23   : > { %v460_v5 = vld [vmem:[%s438_s24] sm:$0xff]  ;;  %v461_v7 = vld [vmem:[%s438_s24 + $0x8] sm:$0xff]  ;;  %v462_v8 = vld [vmem:[%s438_s24 + $0x10] sm:$0xff]  ;;  %v444_v12 = vsub.f32 0.0, %v443_v9  ;;  %p985_p11 = scmp.ne.s32.totalorder %s1284_s29, %s984_s26  ;;  %s1144_s16 = smov [#allocation2]  }
  0x24   : > { %v463_v10 = vld [vmem:[%s438_s24 + $0x18] sm:$0xff]  ;;  %v465_v11 = vld [vmem:[%s438_s24 + $0x28] sm:$0xff]  ;;  %v464_v14 = vld [vmem:[%s438_s24 + $0x20] sm:$0xff]  ;;  %s988_s23 = sshll.u32 %s1144_s16, 4  ;;  %s989_s23 = int_to_ptr.vmem [resolvable:$false] %s988_s23 }
  0x25   : > { %971 = vset.pattern.permute.xlu1 %v1142_v4  ;;  %v445_v13 = vmul.f32 1.442695, %v444_v12  ;;  %v466_v15 = vld [vmem:[%s438_s24 + $0x30] sm:$0xff]  ;;  %s1282_s24 = scalar_lea.hbm %s1468_s6, %s900_s27  ;;  %p986_p12 = pnand %p985_p11, %p1240_p5 }
  0x26   : > { %557 = vperm.xlu0 %969, %v538_v2   ;;  %565 = vperm.xlu1 %971, %v538_v2   ;;  %s990_s0 = scalar_lea.vmem %s989_s23, 32  ;;  %p991_p0 = scmp.lt.s32.totalorder %s1284_s29, %s989_s23 }
  0x27   : > { %976 = vpow2.f32 %v445_v13  ;;  %p987_p13 = pneg %p986_p12  ;;  %p992_p1 = scmp.lt.s32.totalorder %s990_s0, %s984_s26 }
  0x29   : > { %p993_p2 = por %p992_p1, %p991_p0 }
  0x2a   : > { %972 = vset.pattern.permute.xlu0 %v1143_v6  ;;  %973 = vset.pattern.permute.xlu1 %v1141_v1 }
  0x2b   : > { %569 = vperm.xlu0 %972, %v538_v2   ;;  %469 = vperm.xlu1 %973, %v460_v5   ;;  %p994_p3 = pnand %p993_p2, %p987_p13 }
  0x2f   : > { %974 = vset.pattern.permute.xlu0 %v1141_v1  ;;  %474 = vperm.xlu1 %973, %v461_v7  }
  0x30   : > { %479 = vperm.xlu0 %974, %v462_v8  }
  0x31   : > { %v977_v16 = vpop.eup %976 }
  0x32   : > { %v447_v17 = vadd.f32 1.0, %v977_v16 }
  0x33   : > { %484 = vperm.xlu1 %973, %v463_v10  }
  0x34   : > { %494 = vperm.xlu0 %974, %v465_v11   ;;  %978 = vrcp.f32 %v447_v17 }
  0x37   : > { %489 = vperm.xlu1 %973, %v464_v14  }
  0x38   : > { %975 = vset.pattern.permute.xlu0 %v1143_v6 }
  0x3b   : > { %499 = vperm.xlu1 %973, %v466_v15  }
  0x3e   : > { %v979_v18 = vpop.eup %978 }
  0x3f   : > { %v449_v19 = vmul.f32 %v979_v18, %v447_v17 }
  0x41   : > { %v450_v20 = vsub.f32 2.0, %v449_v19 }
  0x43   : > { %v451_v21 = vmul.f32 %v979_v18, %v450_v20 }
  0x45   : > { %452 = vst [vmem:[%s396_s28] sm:$0x1] %v451_v21 }
  0x46   : > { %997 = shalt.err (!%p994_p3)
}
  0x47   : > { %s998_s27 = scalar_lea.hbm %s1282_s24, 16  ;;  %s1002_s16 = scalar_lea.hbm %s1468_s6, 32 }
  0x48   : > { %p999_p4 = scmp.ne.s32.totalorder %s1282_s24, %s998_s27  ;;  %p1003_p9 = scmp.lt.u32.totalorder %s1282_s24, %s1468_s6 }
  0x49   : > { %p1004_p10 = scmp.lt.u32.totalorder %s1002_s16, %s998_s27  ;;  %p1006_p12 = scmp.lt.u32.totalorder %s998_s27, %s1282_s24 }
  0x4a   : > { %p1000_p7 = pnand %p999_p4, %p1240_p5 }
  0x4b   : > { %p1005_p11 = por %p1004_p10, %p1003_p9 }
  0x4c   : > { %p1001_p8 = pneg %p1000_p7 }
  0x4d   : > { %p1007_p13 = por %p1006_p12, %p1005_p11 }
  0x4f   : > { %p1008_p0 = pnand %p1007_p13, %p1001_p8 }
  0x51   : > { %1011 = shalt.err (!%p1008_p0)
}
  0x52   : > { %909 = dma.vmem_to_hbm [thread:$0]  (%p1240_p5), %s1284_s29, 16, %s1282_s24, %s613_s25   ;;  %v539_v22 = vlaneseq  ;;  %vm533_vm0 = vcmask 1041408   ;;  %vm535_vm1 = vcmask 1042432  }
  0x53   : > { %s1480_s0 = sshll.u32 %s1252_s21, 2  ;;  %s1481_s1 = sld [smem:[#allocation13_spill]] }
  0x54   : > { %v540_v27 = vshrl.u32 %v539_v22, 7  ;;  %s891_s29 = sshll.u32 %s1275_s14, 2  ;;  %s906_s24 = smul.u32 56, %s1275_s14 }
  0x55   : > { %s1482_s25 = smul.u32 56, %s1252_s21  ;;  %s616_s21 = sand.u32 1, %s1221_s13  }
  0x56   : > { %v545_v31 = vsub.s32 1, %v540_v27  ;;  %v541_v32 = vsub.s32 0, %v540_v27  ;;  %s901_s23 = sshll.u32 %s1221_s13, 6  ;;  %s1330_s28 = scalar_lea.vmem [#allocation6], %s906_s24 }
  0x57   : > { %s1320_s22 = scalar_lea.vmem %s1465_s3, %s1482_s25  ;;  %s1336_s25 = scalar_lea.hbm %s1469_s7, %s901_s23 }
  0x58   : > { %v453_v44 = vld [vmem:[%s1320_s22] sm:$0xff]  ;;  %v454_v54 = vld [vmem:[%s1320_s22 + $0x8] sm:$0xff]  ;;  %v455_v55 = vld [vmem:[%s1320_s22 + $0x10] sm:$0xff]  ;;  %s1349_s24 = scalar_lea.sflag [#allocation5], %s616_s21  ;;  %s1145_s16 = smov [#allocation4]  }
  0x59   : > { %s424_s17 = scalar_lea.vmem %s1481_s1, %s1480_s0  ;;  %s403_s0 = scalar_lea.vmem [#allocation4], %s891_s29  ;;  %v456_v7 = vld [vmem:[%s1320_s22 + $0x18] sm:$0xff]  ;;  %v458_v8 = vld [vmem:[%s1320_s22 + $0x28] sm:$0xff] }
  0x5a   : > { %v516_v23 = vld [vmem:[%s424_s17] sm:$0xf]  ;;  %s653_s26 = sshll.u32 %s403_s0, 4  ;;  %s1016_s23 = sshll.u32 %s1145_s16, 4  ;;  %s1338_s26 = int_to_ptr.vmem [resolvable:$true] %s653_s26  ;;  %s1017_s23 = int_to_ptr.vmem [resolvable:$false] %s1016_s23 }
  0x5b   : > { %s1012_s27 = scalar_lea.vmem %s1338_s26, 64  ;;  %s1018_s17 = scalar_lea.vmem %s1017_s23, 128 }
  0x5c   : > { %p1013_p1 = scmp.ne.s32.totalorder %s1338_s26, %s1012_s27  ;;  %p1019_p4 = scmp.lt.s32.totalorder %s1338_s26, %s1017_s23 }
  0x5d   : > { %p1020_p7 = scmp.lt.s32.totalorder %s1018_s17, %s1012_s27 }
  0x5e   : > { %p1014_p2 = pnand %p1013_p1, %p1240_p5 }
  0x5f   : > { %p1021_p8 = por %p1020_p7, %p1019_p4 }
  0x60   : > { %p1015_p3 = pneg %p1014_p2 }
  0x62   : > { %p1022_p9 = pnand %p1021_p8, %p1015_p3 }
  0xa0   : > { %v562_v25 = vpop.permute.xlu1 %561 }
  0xa1   : > { %v521_v24 = vpop.permute.xlu0 %520 }
  0xa2   : > { %v523_v26 = vmul.f32 %v521_v24, %v516_v23 }
  0xa4   : > { %v524_v28 = vmul.f32 0.5, %v523_v26 }
  0xa5   : > { %v558_v29 = vpop.permute.xlu0 %557  ;;  %v566_v33 = vpop.permute.xlu1 %565 }
  0xa6   : > { %v526_v30 = vrot.slane %v524_v28, 2  ;;  %v575_v41 = vsub.f32 %v566_v33, %v558_v29 }
  0xa8   : > { %v528_v34 = vsub.f32 %v523_v26, %v526_v30  ;;  %v529_v35 = vadd.f32 %v526_v30, %v523_v26 }
  0xaa   : > { %v546_v36 = vrot.slane %v528_v34, %v545_v31  ;;  %v542_v37 = vrot.slane %v528_v34, %v541_v32  ;;  %v550_v38 = vrot.slane %v529_v35, %v541_v32  ;;  %v570_v39 = vpop.permute.xlu0 %569  ;;  %v554_v40 = vrot.slane %v529_v35, %v545_v31  ;;  %v470_v43 = vpop.permute.xlu1 %469 }
  0xab   : > { %v576_v42 = vsub.f32 %v570_v39, %v562_v25  ;;  %v531_v45 = vrot.slane %v529_v35, 6  ;;  %v502_v59 = vmul.f32 %v470_v43, %v453_v44 }
  0xac   : > { %v583_v46 = vmax.f32 %v546_v36, %v562_v25  ;;  %v599_v47 = vmin.f32 %v546_v36, %v562_v25  ;;  %v579_v48 = vmax.f32 %v542_v37, %v558_v29  ;;  %v596_v49 = vmin.f32 %v542_v37, %v558_v29 }
  0xad   : > { %v578_v50 = vmin.f32 %v550_v38, %v566_v33  ;;  %v595_v51 = vmax.f32 %v550_v38, %v566_v33  ;;  %v572_v52 = vsub.f32 %v550_v38, %v542_v37  ;;  %v573_v53 = vsub.f32 %v554_v40, %v546_v36  ;;  %509 = vst [vmem:[%s1330_s28] sm:$0xff] %v502_v59 }
  0xae   : > { %v577_v56 = vmul.f32 %v576_v42, %v575_v41  ;;  %v582_v57 = vmin.f32 %v554_v40, %v570_v39  ;;  %v598_v58 = vmax.f32 %v554_v40, %v570_v39  ;;  %v475_v63 = vpop.permute.xlu1 %474  ;;  %v534_v1 = vsel %vm533_vm0, %v528_v34, %v531_v45 }
  0xaf   : > { %v580_v60 = vsub.f32 %v578_v50, %v579_v48  ;;  %v597_v61 = vsub.f32 %v595_v51, %v596_v49  ;;  %v574_v62 = vmul.f32 %v573_v53, %v572_v52  ;;  %v480_v0 = vpop.permute.xlu0 %479  ;;  %v503_v4 = vmul.f32 %v475_v63, %v454_v54 }
  0xb0   : > { %v584_v2 = vsub.f32 %v582_v57, %v583_v46  ;;  %v600_v3 = vsub.f32 %v598_v58, %v599_v47  ;;  %v504_v5 = vmul.f32 %v480_v0, %v455_v55  ;;  %v536_v9 = vsel %vm535_vm1, %v534_v1, %v531_v45 }
  0xb1   : > { %v581_v6 = vmax.f32 %v580_v60, 0.0  ;;  %510 = vst [vmem:[%s1330_s28 + $0x8] sm:$0xff] %v503_v4  ;;  %537 = vst [vmem:[%s403_s0] sm:$0xf] %v536_v9  ;;  %v587_v12 = vadd.f32 %v577_v56, %v574_v62 }
  0xb2   : > { %v585_v10 = vmax.f32 %v584_v2, 0.0  ;;  %v1343_v11 = vmul.f32 %v600_v3, %v597_v61  ;;  %511 = vst [vmem:[%s1330_s28 + $0x10] sm:$0xff] %v504_v5  ;;  %v485_v13 = vpop.permute.xlu1 %484 }
  0xb3   : > { %v495_v14 = vpop.permute.xlu0 %494 }
  0xb4   : > { %1025 = shalt.err (!%p1022_p9)
}
  0xb5   : > { %s1026_s21 = scalar_lea.hbm %s1336_s25, 64  ;;  %s1030_s16 = scalar_lea.hbm %s1469_s7, 128 }
  0xb6   : > { %p1027_p10 = scmp.ne.s32.totalorder %s1336_s25, %s1026_s21  ;;  %p1031_p13 = scmp.lt.u32.totalorder %s1336_s25, %s1469_s7 }
  0xb7   : > { %p1032_p0 = scmp.lt.u32.totalorder %s1030_s16, %s1026_s21  ;;  %p1034_p2 = scmp.lt.u32.totalorder %s1026_s21, %s1336_s25 }
  0xb8   : > { %p1028_p11 = pnand %p1027_p10, %p1240_p5 }
  0xb9   : > { %p1033_p1 = por %p1032_p0, %p1031_p13 }
  0xba   : > { %p1029_p12 = pneg %p1028_p11 }
  0xbb   : > { %p1035_p3 = por %p1034_p2, %p1033_p1 }
  0xbd   : > { %p1036_p4 = pnand %p1035_p3, %p1029_p12 }
  0xbf   : > { %1039 = shalt.err (!%p1036_p4)
}
  0xc0   : > { %910 = dma.vmem_to_hbm [thread:$0]  (%p1240_p5), %s1338_s26, 64, %s1336_s25, %s1349_s24   ;;  %v586_v15 = vmul.f32 %v585_v10, %v581_v6  ;;  %v603_v16 = vadd.f32 1e-07, %v1343_v11  ;;  %v505_v17 = vmul.f32 %v485_v13, %v456_v7  ;;  %v507_v18 = vmul.f32 %v495_v14, %v458_v8  ;;  %v457_v19 = vld [vmem:[%s1320_s22 + $0x20] sm:$0xff]  ;;  %v490_v21 = vpop.permute.xlu1 %489  ;;  %v459_v24 = vld [vmem:[%s1320_s22 + $0x30] sm:$0xff] }
  0xc1   : > { %s666_s1 = sshll.u32 %s1330_s28, 4  ;;  %v506_v23 = vmul.f32 %v490_v21, %v457_v19  ;;  %s908_s27 = smul.u32 896, %s1221_s13  ;;  %s1381_s1 = int_to_ptr.vmem [resolvable:$true] %s666_s1 }
  0xc2   : > { %v588_v20 = vsub.f32 %v587_v12, %v586_v15  ;;  %980 = vrcp.f32 %v603_v16  ;;  %512 = vst [vmem:[%s1330_s28 + $0x18] sm:$0xff] %v505_v17  ;;  %514 = vst [vmem:[%s1330_s28 + $0x28] sm:$0xff] %v507_v18  ;;  %s1040_s21 = scalar_lea.vmem %s1381_s1, 896  ;;  %s1146_s22 = smov [#allocation6]  }
  0xc3   : > { %513 = vst [vmem:[%s1330_s28 + $0x20] sm:$0xff] %v506_v23  ;;  %s1386_s17 = scalar_lea.hbm %s1470_s8, %s908_s27  ;;  %p1041_p7 = scmp.ne.s32.totalorder %s1381_s1, %s1040_s21 }
  0xc4   : > { %v589_v22 = vadd.f32 1e-07, %v588_v20  ;;  %v500_v25 = vpop.permute.xlu1 %499  ;;  %s1044_s0 = sshll.u32 %s1146_s22, 4  ;;  %s1045_s0 = int_to_ptr.vmem [resolvable:$false] %s1044_s0 }
  0xc5   : > { %v508_v26 = vmul.f32 %v500_v25, %v459_v24  ;;  %p1042_p8 = pnand %p1041_p7, %p1240_p5  ;;  %s1046_s29 = scalar_lea.vmem %s1045_s0, 1792 }
  0xc6   : > { %982 = vrcp.f32 %v589_v22  ;;  %p1047_p10 = scmp.lt.s32.totalorder %s1381_s1, %s1045_s0  ;;  %p1048_p11 = scmp.lt.s32.totalorder %s1046_s29, %s1040_s21 }
  0xc7   : > { %515 = vst [vmem:[%s1330_s28 + $0x30] sm:$0xff] %v508_v26  ;;  %p1043_p9 = pneg %p1042_p8 }
  0xc8   : > { %p1049_p12 = por %p1048_p11, %p1047_p10 }
  0xca   : > { %p1050_p13 = pnand %p1049_p12, %p1043_p9 }
  0xcc   : > { %1053 = shalt.err (!%p1050_p13)
}
  0xcd   : > { %s1054_s28 = scalar_lea.hbm %s1386_s17, 896  ;;  %s1058_s27 = scalar_lea.hbm %s1470_s8, 1792 }
  0xce   : > { %p1055_p0 = scmp.ne.s32.totalorder %s1386_s17, %s1054_s28  ;;  %p1059_p3 = scmp.lt.u32.totalorder %s1386_s17, %s1470_s8 }
  0xcf   : > { %p1060_p4 = scmp.lt.u32.totalorder %s1058_s27, %s1054_s28  ;;  %p1062_p8 = scmp.lt.u32.totalorder %s1054_s28, %s1386_s17 }
  0xd0   : > { %p1056_p1 = pnand %p1055_p0, %p1240_p5 }
  0xd1   : > { %p1061_p7 = por %p1060_p4, %p1059_p3 }
  0xd2   : > { %p1057_p2 = pneg %p1056_p1 }
  0xd3   : > { %p1063_p9 = por %p1062_p8, %p1061_p7 }
  0xd5   : > { %p1064_p10 = pnand %p1063_p9, %p1057_p2 }
  0xd7   : > { %1067 = shalt.err (!%p1064_p10)
}
  0xd8   : > { %s1147_s21 = smov 128   ;;  %s1148_s22 = smov 8   ;;  %v981_v27 = vpop.eup %980  ;;  %v602_v34 = vsub.f32 %v1343_v11, %v588_v20 }
  0xd9   : > { %911 = dma.vmem_to_hbm [thread:$0]  (%p1240_p5), %s1381_s1, 896, %s1386_s17, %s1349_s24, %s1147_s21, %s1147_s21, %s1148_s22   ;;  %v605_v28 = vmul.f32 %v981_v27, %v603_v16  ;;  %v983_v30 = vpop.eup %982 }
  0xda   : > { %v591_v31 = vmul.f32 %v983_v30, %v589_v22  ;;  %s892_s0 = sshll.u32 %s1275_s14, 3  ;;  %s903_s29 = sshll.u32 %s1221_s13, 7 }
  0xdb   : > { %v606_v29 = vsub.f32 2.0, %v605_v28  ;;  %s417_s28 = scalar_lea.vmem [#allocation7], %s892_s0  ;;  %s1417_s17 = scalar_lea.hbm %s1471_s9, %s903_s29 }
  0xdc   : > { %v592_v32 = vsub.f32 2.0, %v591_v31  ;;  %s682_s16 = sshll.u32 %s417_s28, 4  ;;  %s627_s23 = scalar_lea.sflag [#allocation8], %s1275_s14  ;;  %s1419_s16 = int_to_ptr.vmem [resolvable:$true] %s682_s16 }
  0xdd   : > { %v607_v33 = vmul.f32 %v981_v27, %v606_v29  ;;  %s1068_s27 = scalar_lea.vmem %s1419_s16, 128  ;;  %s1149_s13 = smov [#allocation7]  }
  0xde   : > { %v593_v35 = vmul.f32 %v983_v30, %v592_v32  ;;  %p1069_p11 = scmp.ne.s32.totalorder %s1419_s16, %s1068_s27  ;;  %s1072_s26 = sshll.u32 %s1149_s13, 4  ;;  %s1073_s26 = int_to_ptr.vmem [resolvable:$false] %s1072_s26 }
  0xdf   : > { %v608_v37 = vmul.f32 %v607_v33, %v602_v34  ;;  %s1074_s25 = scalar_lea.vmem %s1073_s26, 256  ;;  %p1075_p0 = scmp.lt.s32.totalorder %s1419_s16, %s1073_s26 }
  0xe0   : > { %v594_v36 = vmul.f32 %v593_v35, %v586_v15  ;;  %p1070_p12 = pnand %p1069_p11, %p1240_p5  ;;  %p1076_p1 = scmp.lt.s32.totalorder %s1074_s25, %s1068_s27 }
  0xe2   : > { %v609_v38 = vsub.f32 %v594_v36, %v608_v37  ;;  %p1071_p13 = pneg %p1070_p12  ;;  %p1077_p2 = por %p1076_p1, %p1075_p0 }
  0xe4   : > { %v610_v39 = vsub.f32 0.0, %v609_v38  ;;  %p1078_p3 = pnand %p1077_p2, %p1071_p13 }
  0xe6   : > { %611 = vst [vmem:[%s417_s28] sm:$0xff] %v610_v39 }
  0xe7   : > { %1081 = shalt.err (!%p1078_p3)
}
  0xe8   : > { %s1082_s14 = scalar_lea.hbm %s1417_s17, 128  ;;  %s1086_s0 = scalar_lea.hbm %s1471_s9, 256 }
  0xe9   : > { %p1083_p4 = scmp.ne.s32.totalorder %s1417_s17, %s1082_s14  ;;  %p1087_p9 = scmp.lt.u32.totalorder %s1417_s17, %s1471_s9 }
  0xea   : > { %p1088_p10 = scmp.lt.u32.totalorder %s1086_s0, %s1082_s14  ;;  %p1090_p12 = scmp.lt.u32.totalorder %s1082_s14, %s1417_s17 }
  0xeb   : > { %p1084_p7 = pnand %p1083_p4, %p1240_p5 }
  0xec   : > { %p1089_p11 = por %p1088_p10, %p1087_p9 }
  0xed   : > { %p1085_p8 = pneg %p1084_p7 }
  0xee   : > { %p1091_p13 = por %p1090_p12, %p1089_p11 }
  0xf0   : > { %p1092_p0 = pnand %p1091_p13, %p1085_p8 }
  0xf2   : > { %1095 = shalt.err (!%p1092_p0)
}
  0xf3   : > { %912 = dma.vmem_to_hbm [thread:$0]  (%p1240_p5), %s1419_s16, 128, %s1417_s17, %s627_s23  }
  0xf4 PF: > { %p930_p1 = scmp.ge.s32.totalorder %s1138_s12, 2  ;;  %s694_s24 = sand.u32 1, %s1126_s30  }
  0xf5   : > { %s695_s1 = scalar_lea.sflag [#allocation3], %s694_s24 }
  0xf6   : > { %p918_p2 = pnand %p930_p1, %p1244_p6 }
  0xf8   : > { %1113 = dma.done.wait (!%p918_p2), %s695_s1, 16  }
  0xf9   : > { %1115 = vsyncadd (!%p918_p2), %s695_s1, 4294967280  ;;  %s1483_s27 = sadd.s32 4294967294, %s1138_s12  }
  0xfa   : > { %s702_s13 = sand.u32 1, %s1483_s27  }
  0xfb   : > { %s703_s26 = scalar_lea.sflag [#allocation5], %s702_s13 }
  0xfc   : > { %1117 = dma.done.wait (!%p918_p2), %s703_s26, 960  }
  0xfd   : > { %1119 = vsyncadd (!%p918_p2), %s703_s26, 4294966336  ;;  %s721_s19 = scalar_lea.sflag [#allocation8], %s694_s24 }
  0xfe   : > { %1121 = dma.done.wait (!%p918_p2), %s721_s19, 128  }
  0xff   : > { %1123 = vsyncadd (!%p918_p2), %s721_s19, 4294967168  ;;  %p26_p5 = scmp.ge.s32.totalorder %s1225_s15, 4   ;;  %s1484_s30 = smov %s1130_s10 }
 0x100   : > { %s1485_s10 = smov %s1134_s11  ;;  %s1486_s11 = smov %s1238_s18 }
 0x101   : > { %s1487_s12 = smov %s1225_s15  ;;  %28 = sbr.rel (!%p26_p5) target bundleno = 10 (0xa), region = 143 }
 0x108   :  { %726 = vsyncpa [#allocation3], 1 }
 0x109   :  { %728 = vsyncpa [#allocation3 + $0x1], 1 }
 0x10a   :  { %729 = vsyncpa [#allocation5], 1 }
 0x10b   :  { %731 = vsyncpa [#allocation5 + $0x1], 1 }
 0x10c   :  { %732 = vsyncpa [#allocation8], 1 }
 0x10d   :  { %734 = vsyncpa [#allocation8 + $0x1], 1 }

</bundles_post_ra>
